<compile_context>
chip_gen: v6e
topology: v6e:2x2x1
jax: 0.10.0
libtpu: 0.0.40
codegen_flags: <defaults>
</compile_context>

<pallas_src>
import jax
import jax.numpy as jnp
from jax.experimental import pallas as pl
from jax.experimental.pallas import tpu as pltpu

VOCAB_SIZE = 400         # input_size of FeatureExtractor
VOCAB_PAD = 512          # 4 * 128 lanes (row 400 carries the folded fc1 bias)
HIDDEN_SIZE = 128
OUTPUT_SIZE = 64         # feature dim (fused away inside the head matmul)
NUM_CLASSES = 2
HEAD_HIDDEN = 2 * HIDDEN_SIZE   # fused label+domain hidden (256)
OUT_LANES = 128          # lane-dense output slab width
ALPHA = 0.1              # only affects backward (gradient reversal); unused in fwd

# TODO(synk): GradientReversal only changes the backward pass (grad * -alpha);
# the forward pass is identity, so there is nothing to translate here.


def dann_kernel(x_ref, w1_ref, hw1_ref, hb1_ref, hw2_ref, hb2_ref, out_ref):
    cdt = x_ref.dtype
    x = x_ref[...]                                                    # (TB, 512)

    # FeatureExtractor fc1 + relu (bias folded into row VOCAB_SIZE of w1,
    # x column VOCAB_SIZE is a constant 1.0).
    h = jnp.maximum(
        jnp.dot(x, w1_ref[...], preferred_element_type=jnp.float32),
        0.0).astype(cdt)                                              # (TB, 128)

    # Fused (fe.fc2 -> {lp.fc1 | dc.fc1}) + relu.
    hd = jnp.maximum(
        jnp.dot(h, hw1_ref[...], preferred_element_type=jnp.float32)
        + hb1_ref[...], 0.0).astype(cdt)                              # (TB, 256)

    # Fused second layer: col0 = l0-l1, col1 = l1-l0, col2 = domain logit.
    z = (jnp.dot(hd, hw2_ref[...], preferred_element_type=jnp.float32)
         + hb2_ref[...])                                              # (TB, 128)

    # softmax over 2 classes == (sigmoid(l0-l1), sigmoid(l1-l0)); the domain
    # sigmoid has the same elementwise form -> one EUP-only epilogue.
    out_ref[...] = (1.0 / (1.0 + jnp.exp(-z))).astype(out_ref.dtype)


def pack_params(p, dtype=jnp.float32):
    """Pad + fuse the torch-layout params into MXU-friendly operands."""
    # fc1: pad K to 512, fold bias into row VOCAB_SIZE.
    fe_w1 = jnp.zeros((VOCAB_PAD, HIDDEN_SIZE), jnp.float32)
    fe_w1 = fe_w1.at[:VOCAB_SIZE].set(p["fe_w1"])
    fe_w1 = fe_w1.at[VOCAB_SIZE].set(p["fe_b1"][0])

    # Fuse fe.fc2 with the two head fc1 layers (no nonlinearity in between):
    #   relu(feat) with feat = h @ fe_w2 + fe_b2, head = feat @ [lp_w1|dc_w1] + b
    #   ==> head = h @ (fe_w2 @ [lp_w1|dc_w1]) + (fe_b2 @ [lp_w1|dc_w1] + b)
    head_w1 = jnp.concatenate([p["lp_w1"], p["dc_w1"]], axis=1)       # (64, 256)
    head_b1 = jnp.concatenate([p["lp_b1"], p["dc_b1"]], axis=1)       # (1, 256)
    hw1 = p["fe_w2"].astype(jnp.float32) @ head_w1                    # (128, 256)
    hb1 = p["fe_b2"].astype(jnp.float32) @ head_w1 + head_b1          # (1, 256)

    # Fused second layer (block-diagonal, logit-difference trick).
    hw2 = jnp.zeros((HEAD_HIDDEN, OUT_LANES), jnp.float32)
    hw2 = hw2.at[:HIDDEN_SIZE, 0].set(p["lp_w2"][:, 0] - p["lp_w2"][:, 1])
    hw2 = hw2.at[:HIDDEN_SIZE, 1].set(p["lp_w2"][:, 1] - p["lp_w2"][:, 0])
    hw2 = hw2.at[HIDDEN_SIZE:, 2].set(p["dc_w2"][:, 0])
    hb2 = jnp.zeros((1, OUT_LANES), jnp.float32)
    hb2 = hb2.at[0, 0].set(p["lp_b2"][0, 0] - p["lp_b2"][0, 1])
    hb2 = hb2.at[0, 1].set(p["lp_b2"][0, 1] - p["lp_b2"][0, 0])
    hb2 = hb2.at[0, 2].set(p["dc_b2"][0, 0])

    cast = lambda a: a.astype(dtype)
    # biases stay f32: they are added to the f32 MXU accumulator.
    return (cast(fe_w1), cast(hw1), hb1.astype(jnp.float32),
            cast(hw2), hb2)


def dann_forward(x, params, *, reverse=True, block_b=512, dtype=jnp.float32):
    """x: (B, VOCAB_SIZE). Returns (label_probs (B, 2), domain_prob (B, 1)).

    `reverse` is accepted for API parity; the gradient-reversal layer is the
    identity in the forward pass.  Set dtype=jnp.bfloat16 on v5e/v6e/v7x for
    ~2x MXU throughput (accumulation stays f32); relax tolerances accordingly.
    """
    del reverse
    B = x.shape[0]
    packed = pack_params(params, dtype)

    # Batch tile: multiple of 8 (f32 sublanes), capped at block_b.
    b8 = -(-B // 8) * 8
    tb = min(block_b, b8)
    b_pad = -(-B // tb) * tb
    num_tiles = b_pad // tb

    x_p = jnp.zeros((b_pad, VOCAB_PAD), dtype)
    x_p = x_p.at[:B, :VOCAB_SIZE].set(x.astype(dtype))
    x_p = x_p.at[:, VOCAB_SIZE].set(jnp.asarray(1.0, dtype))  # folded-bias lane

    flops = 2 * b_pad * (VOCAB_PAD * HIDDEN_SIZE
                         + HIDDEN_SIZE * HEAD_HIDDEN
                         + HEAD_HIDDEN * OUT_LANES)
    bytes_accessed = (int(x_p.size) * x_p.dtype.itemsize
                      + sum(int(a.size) * a.dtype.itemsize for a in packed)
                      + b_pad * OUT_LANES * 4)
    cost = pl.CostEstimate(flops=flops,
                           transcendentals=b_pad * OUT_LANES,
                           bytes_accessed=bytes_accessed)

    def resident(a):  # full-array block, constant index -> fetched once
        return pl.BlockSpec(a.shape, lambda i: (0, 0))

    slab = pl.pallas_call(
        dann_kernel,
        out_shape=jax.ShapeDtypeStruct((b_pad, OUT_LANES), jnp.float32),
        grid_spec=pltpu.PrefetchScalarGridSpec(
            num_scalar_prefetch=0,
            grid=(num_tiles,),
            in_specs=[pl.BlockSpec((tb, VOCAB_PAD), lambda i: (i, 0))]
                     + [resident(a) for a in packed],
            out_specs=pl.BlockSpec((tb, OUT_LANES), lambda i: (i, 0)),
        ),
        compiler_params=pltpu.CompilerParams(
            dimension_semantics=("parallel",)),
        cost_estimate=cost,
    )(x_p, *packed)

    label = slab[:B, :NUM_CLASSES]                   # softmax probs
    domain = slab[:B, NUM_CLASSES:NUM_CLASSES + 1]   # sigmoid prob
    return label, domain


def init_params(key):
    """Deterministic init. Weights stored as (in, out) = W.T of torch Linear."""
    ks = jax.random.split(key, 12)

    def lin(kw, kb, fan_in, fan_out):
        bound = 1.0 / jnp.sqrt(fan_in)
        w = jax.random.uniform(kw, (fan_in, fan_out), jnp.float32, -bound, bound)
        b = jax.random.uniform(kb, (1, fan_out), jnp.float32, -bound, bound)
        return w, b

    fe_w1, fe_b1 = lin(ks[0], ks[1], VOCAB_SIZE, HIDDEN_SIZE)
    fe_w2, fe_b2 = lin(ks[2], ks[3], HIDDEN_SIZE, OUTPUT_SIZE)
    lp_w1, lp_b1 = lin(ks[4], ks[5], OUTPUT_SIZE, HIDDEN_SIZE)
    lp_w2, lp_b2 = lin(ks[6], ks[7], HIDDEN_SIZE, NUM_CLASSES)
    dc_w1, dc_b1 = lin(ks[8], ks[9], OUTPUT_SIZE, HIDDEN_SIZE)
    dc_w2, dc_b2 = lin(ks[10], ks[11], HIDDEN_SIZE, 1)

    return dict(
        fe_w1=fe_w1, fe_b1=fe_b1, fe_w2=fe_w2, fe_b2=fe_b2,
        lp_w1=lp_w1, lp_b1=lp_b1, lp_w2=lp_w2, lp_b2=lp_b2,
        dc_w1=dc_w1, dc_b1=dc_b1, dc_w2=dc_w2, dc_b2=dc_b2,
    )


def dann_reference(x, p):
    """Plain-JAX reference of the same forward pass (unfused, unpadded)."""
    feat = jnp.maximum(x @ p["fe_w1"] + p["fe_b1"], 0.0) @ p["fe_w2"] + p["fe_b2"]
    lh = jnp.maximum(feat @ p["lp_w1"] + p["lp_b1"], 0.0)
    label = jax.nn.softmax(lh @ p["lp_w2"] + p["lp_b2"], axis=1)
    dh = jnp.maximum(feat @ p["dc_w1"] + p["dc_b1"], 0.0)
    domain = jax.nn.sigmoid(dh @ p["dc_w2"] + p["dc_b2"])
    return label, domain


if __name__ == "__main__":
    key = jax.random.PRNGKey(0)
    kx, kp = jax.random.split(key)

    B = 8  # small batch
    x = jax.random.normal(kx, (B, VOCAB_SIZE), jnp.float32)
    params = init_params(kp)

    label_out, domain_out = dann_forward(x, params)
    jax.block_until_ready((label_out, domain_out))

    # sanity-check against the pure-JAX reference
    label_ref, domain_ref = dann_reference(x, params)
    assert label_out.shape == (B, NUM_CLASSES)
    assert domain_out.shape == (B, 1)
    assert jnp.allclose(label_out, label_ref, atol=1e-4, rtol=1e-4)
    assert jnp.allclose(domain_out, domain_ref, atol=1e-4, rtol=1e-4)

    print("KERNEL_OK")
</pallas_src>

<mosaic_0001>
module attributes {stable_mosaic.version = 11 : i64} {
  func.func @dann_kernel(%arg0: i32, %arg1: memref<8x512xf32, #tpu.memory_space<vmem>>, %arg2: memref<512x128xf32, #tpu.memory_space<vmem>>, %arg3: memref<128x256xf32, #tpu.memory_space<vmem>>, %arg4: memref<1x256xf32, #tpu.memory_space<vmem>>, %arg5: memref<256x128xf32, #tpu.memory_space<vmem>>, %arg6: memref<1x128xf32, #tpu.memory_space<vmem>>, %arg7: memref<8x128xf32, #tpu.memory_space<vmem>>) attributes {dimension_semantics = [#tpu.dimension_semantics<parallel>], iteration_bounds = array<i64: 1>, scalar_prefetch = 0 : i64, scratch_operands = 0 : i64, tpu.core_type = #tpu.core_type<tc>, window_params = [{transform_indices = @transform_0, window_bounds = array<i64: 8, 512>}, {pipeline_mode = #tpu.pipeline_mode<synchronous>, transform_indices = @transform_1, window_bounds = array<i64: 512, 128>}, {pipeline_mode = #tpu.pipeline_mode<synchronous>, transform_indices = @transform_2, window_bounds = array<i64: 128, 256>}, {pipeline_mode = #tpu.pipeline_mode<synchronous>, transform_indices = @transform_3, window_bounds = array<i64: 1, 256>}, {pipeline_mode = #tpu.pipeline_mode<synchronous>, transform_indices = @transform_4, window_bounds = array<i64: 256, 128>}, {pipeline_mode = #tpu.pipeline_mode<synchronous>, transform_indices = @transform_5, window_bounds = array<i64: 1, 128>}, {transform_indices = @transform_6, window_bounds = array<i64: 8, 128>}]} {
    %c0 = arith.constant 0 : index
    %c0_0 = arith.constant 0 : index
    %0 = vector.load %arg1[%c0, %c0_0] : memref<8x512xf32, #tpu.memory_space<vmem>>, vector<8x512xf32>
    %c0_1 = arith.constant 0 : index
    %c0_2 = arith.constant 0 : index
    %1 = vector.load %arg2[%c0_1, %c0_2] : memref<512x128xf32, #tpu.memory_space<vmem>>, vector<512x128xf32>
    %cst = arith.constant dense<0.000000e+00> : vector<8x128xf32>
    %2 = tpu.matmul %0, %1, %cst {dimension_numbers = #tpu.dot_dimension_numbers<[1], [0], [0], [1], [0, 0, 1, 1], [], []>} : vector<8x512xf32>, vector<512x128xf32>, vector<8x128xf32> -> vector<8x128xf32>
    %cst_3 = arith.constant 0.000000e+00 : f32
    %3 = vector.broadcast %cst_3 : f32 to vector<8x128xf32>
    %4 = arith.maximumf %2, %3 : vector<8x128xf32>
    %c0_4 = arith.constant 0 : index
    %c0_5 = arith.constant 0 : index
    %5 = vector.load %arg3[%c0_4, %c0_5] : memref<128x256xf32, #tpu.memory_space<vmem>>, vector<128x256xf32>
    %cst_6 = arith.constant dense<0.000000e+00> : vector<8x256xf32>
    %6 = tpu.matmul %4, %5, %cst_6 {dimension_numbers = #tpu.dot_dimension_numbers<[1], [0], [0], [1], [0, 0, 1, 1], [], []>} : vector<8x128xf32>, vector<128x256xf32>, vector<8x256xf32> -> vector<8x256xf32>
    %c0_7 = arith.constant 0 : index
    %c0_8 = arith.constant 0 : index
    %7 = vector.load %arg4[%c0_7, %c0_8] : memref<1x256xf32, #tpu.memory_space<vmem>>, vector<1x256xf32>
    %8 = vector.broadcast %7 : vector<1x256xf32> to vector<8x256xf32>
    %9 = arith.addf %6, %8 : vector<8x256xf32>
    %cst_9 = arith.constant 0.000000e+00 : f32
    %10 = vector.broadcast %cst_9 : f32 to vector<8x256xf32>
    %11 = arith.maximumf %9, %10 : vector<8x256xf32>
    %c0_10 = arith.constant 0 : index
    %c0_11 = arith.constant 0 : index
    %12 = vector.load %arg5[%c0_10, %c0_11] : memref<256x128xf32, #tpu.memory_space<vmem>>, vector<256x128xf32>
    %cst_12 = arith.constant dense<0.000000e+00> : vector<8x128xf32>
    %13 = tpu.matmul %11, %12, %cst_12 {dimension_numbers = #tpu.dot_dimension_numbers<[1], [0], [0], [1], [0, 0, 1, 1], [], []>} : vector<8x256xf32>, vector<256x128xf32>, vector<8x128xf32> -> vector<8x128xf32>
    %c0_13 = arith.constant 0 : index
    %c0_14 = arith.constant 0 : index
    %14 = vector.load %arg6[%c0_13, %c0_14] : memref<1x128xf32, #tpu.memory_space<vmem>>, vector<1x128xf32>
    %15 = vector.broadcast %14 : vector<1x128xf32> to vector<8x128xf32>
    %16 = arith.addf %13, %15 : vector<8x128xf32>
    %cst_15 = arith.constant 0.000000e+00 : f32
    %17 = vector.broadcast %cst_15 : f32 to vector<8x128xf32>
    %18 = arith.subf %17, %16 : vector<8x128xf32>
    %19 = math.exp %18 : vector<8x128xf32>
    %cst_16 = arith.constant 1.000000e+00 : f32
    %20 = vector.broadcast %cst_16 : f32 to vector<8x128xf32>
    %21 = arith.addf %20, %19 : vector<8x128xf32>
    %cst_17 = arith.constant 1.000000e+00 : f32
    %22 = vector.broadcast %cst_17 : f32 to vector<8x128xf32>
    %23 = arith.divf %22, %21 : vector<8x128xf32>
    %c0_18 = arith.constant 0 : index
    %c0_19 = arith.constant 0 : index
    %24 = vector.load %arg7[%c0_18, %c0_19] : memref<8x128xf32, #tpu.memory_space<vmem>>, vector<8x128xf32>
    tpu.vector_store %arg7[%c0_18, %c0_19], %23 {strides = array<i32>} : memref<8x128xf32, #tpu.memory_space<vmem>>, vector<8x128xf32>,
    return
  }
  func.func @transform_0(%arg0: i32) -> (i32, i32) {
    %c0_i32 = arith.constant 0 : i32
    %c0_i32_0 = arith.constant 0 : i32
    return %arg0, %c0_i32 : i32, i32
  }
  func.func @transform_1(%arg0: i32) -> (i32, i32) {
    %c0_i32 = arith.constant 0 : i32
    %c0_i32_0 = arith.constant 0 : i32
    %c0_i32_1 = arith.constant 0 : i32
    return %c0_i32, %c0_i32_0 : i32, i32
  }
  func.func @transform_2(%arg0: i32) -> (i32, i32) {
    %c0_i32 = arith.constant 0 : i32
    %c0_i32_0 = arith.constant 0 : i32
    %c0_i32_1 = arith.constant 0 : i32
    return %c0_i32, %c0_i32_0 : i32, i32
  }
  func.func @transform_3(%arg0: i32) -> (i32, i32) {
    %c0_i32 = arith.constant 0 : i32
    %c0_i32_0 = arith.constant 0 : i32
    %c0_i32_1 = arith.constant 0 : i32
    return %c0_i32, %c0_i32_0 : i32, i32
  }
  func.func @transform_4(%arg0: i32) -> (i32, i32) {
    %c0_i32 = arith.constant 0 : i32
    %c0_i32_0 = arith.constant 0 : i32
    %c0_i32_1 = arith.constant 0 : i32
    return %c0_i32, %c0_i32_0 : i32, i32
  }
  func.func @transform_5(%arg0: i32) -> (i32, i32) {
    %c0_i32 = arith.constant 0 : i32
    %c0_i32_0 = arith.constant 0 : i32
    %c0_i32_1 = arith.constant 0 : i32
    return %c0_i32, %c0_i32_0 : i32, i32
  }
  func.func @transform_6(%arg0: i32) -> (i32, i32) {
    %c0_i32 = arith.constant 0 : i32
    %c0_i32_0 = arith.constant 0 : i32
    return %arg0, %c0_i32 : i32, i32
  }
}

</mosaic_0001>

<bundles_post_ra>
// kernel: tpu_custom_call.1
= control target key start
LH: loop header
LB: loop body
LE: loop exit
PB: predicated region body
PF: predicated region fallthrough
CT: control target
= control target key end

     0   :  { %11 = vsyncpa [#allocation3], 0  ;;  %s836_s0 = inlined_call_operand.hbm [shape: f32[8,512], index: 0, kind: input, shape index: {}]   ;;  %s837_s1 = inlined_call_operand.hbm [shape: f32[512,128], index: 1, kind: input, shape index: {}]   ;;  %s838_s2 = inlined_call_operand.hbm [shape: f32[128,256], index: 2, kind: input, shape index: {}]   ;;  %s839_s3 = inlined_call_operand.vmem [shape: f32[1,256], index: 3, kind: input, shape index: {}]   ;;  %s840_s4 = inlined_call_operand.hbm [shape: f32[256,128], index: 4, kind: input, shape index: {}]   ;;  %s841_s5 = inlined_call_operand.vmem [shape: f32[1,128], index: 5, kind: input, shape index: {}]   ;;  %s842_s6 = inlined_call_operand.hbm [shape: f32[8,128], index: 6, kind: output, shape index: {}]  }
   0x1   :  { %12 = vsyncpa [#allocation6], 0 }
   0x2   :  { %13 = vsyncpa [#allocation9], 0 }
   0x3   :  { %14 = vsyncpa [#allocation4], 0  ;;  %s764_s21 = smov [#allocation5]  }
   0x4   :  { %s30_s22 = sshll.u32 %s764_s21, 4  ;;  %s31_s22 = int_to_ptr.vmem [resolvable:$true] %s30_s22 }
   0x5   :  { %s664_s23 = scalar_lea.vmem %s31_s22, 8192  ;;  %p669_p1 = scmp.lt.s32.totalorder %s31_s22, %s31_s22 }
   0x6   :  { %p665_p0 = scmp.ne.s32.totalorder %s31_s22, %s664_s23  ;;  %p670_p2 = scmp.lt.s32.totalorder %s664_s23, %s664_s23 }
   0x8   :  { %p671_p3 = por %p670_p2, %p669_p1 }
   0xa   :  { %p672_p4 = pnand %p671_p3, %p665_p0 }
   0xc   :  { %675 = shalt.err (!%p672_p4)
}
   0xd   :  { %s765_s24 = smov 128   ;;  %s766_s25 = smov 8  }
   0xe   :  { %36 = dma.hbm_to_vmem [thread:$0]  %s837_s1, 8192, %s31_s22, [#allocation6], %s765_s24, %s765_s24, %s766_s25  }
   0xf   :  { %s767_s28 = smov [#allocation2]   ;;  %s768_s30 = smov [#allocation7]  }
  0x10   :  { %s21_s29 = sshll.u32 %s767_s28, 4  ;;  %s42_s7 = sshll.u32 %s768_s30, 4  ;;  %s22_s29 = int_to_ptr.vmem [resolvable:$true] %s21_s29  ;;  %s43_s7 = int_to_ptr.vmem [resolvable:$true] %s42_s7 }
  0x11   :  { %s684_s8 = scalar_lea.vmem %s22_s29, 512  ;;  %p689_p6 = scmp.lt.s32.totalorder %s22_s29, %s22_s29 }
  0x12   :  { %p685_p5 = scmp.ne.s32.totalorder %s22_s29, %s684_s8  ;;  %p690_p7 = scmp.lt.s32.totalorder %s684_s8, %s684_s8 }
  0x14   :  { %p691_p8 = por %p690_p7, %p689_p6 }
  0x16   :  { %p692_p9 = pnand %p691_p8, %p685_p5 }
  0x18   :  { %695 = shalt.err (!%p692_p9)
}
  0x19   :  { %24 = dma.hbm_to_vmem [thread:$0]  %s836_s0, 512, %s22_s29, [#allocation3]  }
  0x1a   :  { %s704_s11 = scalar_lea.vmem %s43_s7, 4096  ;;  %p709_p11 = scmp.lt.s32.totalorder %s43_s7, %s43_s7 }
  0x1b   :  { %p705_p10 = scmp.ne.s32.totalorder %s43_s7, %s704_s11  ;;  %p710_p12 = scmp.lt.s32.totalorder %s704_s11, %s704_s11 }
  0x1d   :  { %p711_p13 = por %p710_p12, %p709_p11 }
  0x1f   :  { %p712_p0 = pnand %p711_p13, %p705_p10 }
  0x21   :  { %715 = shalt.err (!%p712_p0)
}
  0x22   :  { %s769_s1 = smov 256   ;;  %s770_s12 = smov 16  }
  0x23   :  { %48 = dma.hbm_to_vmem [thread:$0]  %s838_s2, 4096, %s43_s7, [#allocation6], %s769_s1, %s769_s1, %s770_s12  }
  0x24   :  { %s771_s15 = smov [#allocation8]  }
  0x25   :  { %s56_s16 = sshll.u32 %s771_s15, 4  ;;  %s57_s16 = int_to_ptr.vmem [resolvable:$true] %s56_s16 }
  0x26   :  { %s724_s17 = scalar_lea.vmem %s57_s16, 4096  ;;  %p729_p2 = scmp.lt.s32.totalorder %s57_s16, %s57_s16 }
  0x27   :  { %p725_p1 = scmp.ne.s32.totalorder %s57_s16, %s724_s17  ;;  %p730_p3 = scmp.lt.s32.totalorder %s724_s17, %s724_s17 }
  0x29   :  { %p731_p4 = por %p730_p3, %p729_p2 }
  0x2b   :  { %p732_p5 = pnand %p731_p4, %p725_p1 }
  0x2d   :  { %735 = shalt.err (!%p732_p5)
}
  0x2e   :  { %62 = dma.hbm_to_vmem [thread:$0]  %s840_s4, 4096, %s57_s16, [#allocation9], %s765_s24, %s765_s24, %s766_s25  }
  0x2f   :  { %756 = dma.done.wait [#allocation3], 512  }
  0x30   :  { %757 = vsyncadd [#allocation3], 4294966784 }
  0x31   :  { %758 = dma.done.wait [#allocation6], 12288  }
  0x32   :  { %759 = vsyncadd [#allocation6], 4294955008 }
  0x33   :  { %760 = dma.done.wait [#allocation9], 4096  }
  0x34   :  { %761 = vsyncadd [#allocation9], 4294963200  ;;  %v112_v0 = vld [vmem:[#allocation5 + $0xf8] sm:$0xff]  ;;  %v111_v4 = vld [vmem:[#allocation5 + $0xf0] sm:$0xff] }
  0x35   :  { %v144_v1 = vld [vmem:[#allocation5 + $0x1f8] sm:$0xff]  ;;  %537 = vmatprep.subr.mxu0 %v112_v0  ;;  %v143_v5 = vld [vmem:[#allocation5 + $0x1f0] sm:$0xff]  ;;  %v110_v8 = vld [vmem:[#allocation5 + $0xe8] sm:$0xff] }
  0x36   :  { %v96_v2 = vld [vmem:[#allocation5 + $0x78] sm:$0xff]  ;;  %572 = vmatprep.subr.mxu1 %v144_v1  ;;  %v95_v6 = vld [vmem:[#allocation5 + $0x70] sm:$0xff]  ;;  %v142_v9 = vld [vmem:[#allocation5 + $0x1e8] sm:$0xff] }
  0x37   :  { %v128_v3 = vld [vmem:[#allocation5 + $0x178] sm:$0xff]  ;;  %538 = vmatpush3.msra.mxu0 %v96_v2  ;;  %v127_v7 = vld [vmem:[#allocation5 + $0x170] sm:$0xff]  ;;  %v94_v10 = vld [vmem:[#allocation5 + $0x68] sm:$0xff] }
  0x38   :  { %573 = vmatpush3.msra.mxu1 %v128_v3  ;;  %539 = vmatprep.subr.mxu0 %v111_v4  ;;  %v126_v11 = vld [vmem:[#allocation5 + $0x168] sm:$0xff]  ;;  %v109_v12 = vld [vmem:[#allocation5 + $0xe0] sm:$0xff]  ;;  %v108_v16 = vld [vmem:[#allocation5 + $0xd8] sm:$0xff] }
  0x39   :  { %574 = vmatprep.subr.mxu1 %v143_v5  ;;  %540 = vmatpush3.msra.mxu0 %v95_v6  ;;  %v141_v13 = vld [vmem:[#allocation5 + $0x1e0] sm:$0xff]  ;;  %v140_v17 = vld [vmem:[#allocation5 + $0x1d8] sm:$0xff]  ;;  %v107_v20 = vld [vmem:[#allocation5 + $0xd0] sm:$0xff] }
  0x3a   :  { %575 = vmatpush3.msra.mxu1 %v127_v7  ;;  %541 = vmatprep.subr.mxu0 %v110_v8  ;;  %v93_v14 = vld [vmem:[#allocation5 + $0x60] sm:$0xff]  ;;  %v92_v18 = vld [vmem:[#allocation5 + $0x58] sm:$0xff]  ;;  %v139_v21 = vld [vmem:[#allocation5 + $0x1d0] sm:$0xff] }
  0x3b   :  { %576 = vmatprep.subr.mxu1 %v142_v9  ;;  %v125_v15 = vld [vmem:[#allocation5 + $0x160] sm:$0xff]  ;;  %542 = vmatpush3.msra.mxu0 %v94_v10  ;;  %v124_v19 = vld [vmem:[#allocation5 + $0x158] sm:$0xff]  ;;  %v91_v22 = vld [vmem:[#allocation5 + $0x50] sm:$0xff] }
  0x3c   :  { %577 = vmatpush3.msra.mxu1 %v126_v11  ;;  %543 = vmatprep.subr.mxu0 %v109_v12  ;;  %v123_v23 = vld [vmem:[#allocation5 + $0x150] sm:$0xff]  ;;  %v106_v24 = vld [vmem:[#allocation5 + $0xc8] sm:$0xff]  ;;  %v105_v28 = vld [vmem:[#allocation5 + $0xc0] sm:$0xff] }
  0x3d   :  { %578 = vmatprep.subr.mxu1 %v141_v13  ;;  %544 = vmatpush3.msra.mxu0 %v93_v14  ;;  %v138_v25 = vld [vmem:[#allocation5 + $0x1c8] sm:$0xff]  ;;  %v137_v29 = vld [vmem:[#allocation5 + $0x1c0] sm:$0xff]  ;;  %v104_v32 = vld [vmem:[#allocation5 + $0xb8] sm:$0xff] }
  0x3e   :  { %579 = vmatpush3.msra.mxu1 %v125_v15  ;;  %545 = vmatprep.subr.mxu0 %v108_v16  ;;  %v90_v26 = vld [vmem:[#allocation5 + $0x48] sm:$0xff]  ;;  %v89_v30 = vld [vmem:[#allocation5 + $0x40] sm:$0xff]  ;;  %v136_v33 = vld [vmem:[#allocation5 + $0x1b8] sm:$0xff] }
  0x3f   :  { %580 = vmatprep.subr.mxu1 %v140_v17  ;;  %546 = vmatpush3.msra.mxu0 %v92_v18  ;;  %v122_v27 = vld [vmem:[#allocation5 + $0x148] sm:$0xff]  ;;  %v121_v31 = vld [vmem:[#allocation5 + $0x140] sm:$0xff]  ;;  %v88_v34 = vld [vmem:[#allocation5 + $0x38] sm:$0xff] }
  0x40   :  { %581 = vmatpush3.msra.mxu1 %v124_v19  ;;  %547 = vmatprep.subr.mxu0 %v107_v20  ;;  %v120_v35 = vld [vmem:[#allocation5 + $0x138] sm:$0xff]  ;;  %v103_v36 = vld [vmem:[#allocation5 + $0xb0] sm:$0xff]  ;;  %v102_v40 = vld [vmem:[#allocation5 + $0xa8] sm:$0xff] }
  0x41   :  { %582 = vmatprep.subr.mxu1 %v139_v21  ;;  %548 = vmatpush3.msra.mxu0 %v91_v22  ;;  %v135_v37 = vld [vmem:[#allocation5 + $0x1b0] sm:$0xff]  ;;  %v134_v41 = vld [vmem:[#allocation5 + $0x1a8] sm:$0xff]  ;;  %v101_v44 = vld [vmem:[#allocation5 + $0xa0] sm:$0xff] }
  0x42   :  { %583 = vmatpush3.msra.mxu1 %v123_v23  ;;  %549 = vmatprep.subr.mxu0 %v106_v24  ;;  %v87_v38 = vld [vmem:[#allocation5 + $0x30] sm:$0xff]  ;;  %v86_v42 = vld [vmem:[#allocation5 + $0x28] sm:$0xff]  ;;  %v133_v45 = vld [vmem:[#allocation5 + $0x1a0] sm:$0xff] }
  0x43   :  { %584 = vmatprep.subr.mxu1 %v138_v25  ;;  %550 = vmatpush3.msra.mxu0 %v90_v26  ;;  %v119_v39 = vld [vmem:[#allocation5 + $0x130] sm:$0xff]  ;;  %v118_v43 = vld [vmem:[#allocation5 + $0x128] sm:$0xff]  ;;  %v85_v46 = vld [vmem:[#allocation5 + $0x20] sm:$0xff] }
  0x44   :  { %585 = vmatpush3.msra.mxu1 %v122_v27  ;;  %551 = vmatprep.subr.mxu0 %v105_v28  ;;  %v117_v47 = vld [vmem:[#allocation5 + $0x120] sm:$0xff]  ;;  %v100_v48 = vld [vmem:[#allocation5 + $0x98] sm:$0xff]  ;;  %v99_v52 = vld [vmem:[#allocation5 + $0x90] sm:$0xff] }
  0x45   :  { %586 = vmatprep.subr.mxu1 %v137_v29  ;;  %552 = vmatpush3.msra.mxu0 %v89_v30  ;;  %v132_v49 = vld [vmem:[#allocation5 + $0x198] sm:$0xff]  ;;  %v131_v53 = vld [vmem:[#allocation5 + $0x190] sm:$0xff]  ;;  %v98_v56 = vld [vmem:[#allocation5 + $0x88] sm:$0xff] }
  0x46   :  { %587 = vmatpush3.msra.mxu1 %v121_v31  ;;  %553 = vmatprep.subr.mxu0 %v104_v32  ;;  %v84_v50 = vld [vmem:[#allocation5 + $0x18] sm:$0xff]  ;;  %v83_v54 = vld [vmem:[#allocation5 + $0x10] sm:$0xff]  ;;  %v130_v57 = vld [vmem:[#allocation5 + $0x188] sm:$0xff] }
  0x47   :  { %588 = vmatprep.subr.mxu1 %v136_v33  ;;  %554 = vmatpush3.msra.mxu0 %v88_v34  ;;  %v116_v51 = vld [vmem:[#allocation5 + $0x118] sm:$0xff]  ;;  %v115_v55 = vld [vmem:[#allocation5 + $0x110] sm:$0xff]  ;;  %v82_v58 = vld [vmem:[#allocation5 + $0x8] sm:$0xff] }
  0x48   :  { %589 = vmatpush3.msra.mxu1 %v120_v35  ;;  %555 = vmatprep.subr.mxu0 %v103_v36  ;;  %v114_v59 = vld [vmem:[#allocation5 + $0x108] sm:$0xff]  ;;  %v97_v60 = vld [vmem:[#allocation5 + $0x80] sm:$0xff]  ;;  %v80_v1 = vld [vmem:[#allocation2 + $0x18] sm:$0xff]  ;;  %v772_v36 = vmov 0.0  }
  0x49   :  { %590 = vmatprep.subr.mxu1 %v135_v37  ;;  %556 = vmatpush3.msra.mxu0 %v87_v38  ;;  %v129_v61 = vld [vmem:[#allocation5 + $0x180] sm:$0xff]  ;;  %v78_v63 = vld [vmem:[#allocation2 + $0x8] sm:$0xff]  ;;  %v79_v3 = vld [vmem:[#allocation2 + $0x10] sm:$0xff] }
  0x4a   :  { %591 = vmatpush3.msra.mxu1 %v119_v39  ;;  %557 = vmatprep.subr.mxu0 %v102_v40  ;;  %v81_v62 = vld [vmem:[#allocation5] sm:$0xff]  ;;  %v317_v4 = vld [vmem:[#allocation7 + $0xf8] sm:$0xff]  ;;  %v316_v5 = vld [vmem:[#allocation7 + $0xf0] sm:$0xff] }
  0x4b   :  { %592 = vmatprep.subr.mxu1 %v134_v41  ;;  %558 = vmatpush3.msra.mxu0 %v86_v42  ;;  %v113_v0 = vld [vmem:[#allocation5 + $0x100] sm:$0xff]  ;;  %v315_v6 = vld [vmem:[#allocation7 + $0xe8] sm:$0xff]  ;;  %v313_v8 = vld [vmem:[#allocation7 + $0xd8] sm:$0xff] }
  0x4c   :  { %593 = vmatpush3.msra.mxu1 %v118_v43  ;;  %559 = vmatprep.subr.mxu0 %v101_v44  ;;  %v77_v2 = vld [vmem:[#allocation2] sm:$0xff]  ;;  %v312_v9 = vld [vmem:[#allocation7 + $0xd0] sm:$0xff]  ;;  %v311_v10 = vld [vmem:[#allocation7 + $0xc8] sm:$0xff] }
  0x4d   :  { %594 = vmatprep.subr.mxu1 %v133_v45  ;;  %560 = vmatpush3.msra.mxu0 %v85_v46  ;;  %v314_v7 = vld [vmem:[#allocation7 + $0xe0] sm:$0xff]  ;;  %v309_v12 = vld [vmem:[#allocation7 + $0xb8] sm:$0xff]  ;;  %v308_v13 = vld [vmem:[#allocation7 + $0xb0] sm:$0xff] }
  0x4e   :  { %595 = vmatpush3.msra.mxu1 %v117_v47  ;;  %561 = vmatprep.subr.mxu0 %v100_v48  ;;  %v310_v11 = vld [vmem:[#allocation7 + $0xc0] sm:$0xff]  ;;  %v307_v14 = vld [vmem:[#allocation7 + $0xa8] sm:$0xff]  ;;  %v305_v16 = vld [vmem:[#allocation7 + $0x98] sm:$0xff] }
  0x4f   :  { %596 = vmatprep.subr.mxu1 %v132_v49  ;;  %562 = vmatpush3.msra.mxu0 %v84_v50  ;;  %v306_v15 = vld [vmem:[#allocation7 + $0xa0] sm:$0xff]  ;;  %v304_v17 = vld [vmem:[#allocation7 + $0x90] sm:$0xff]  ;;  %v303_v18 = vld [vmem:[#allocation7 + $0x88] sm:$0xff] }
  0x50   :  { %597 = vmatpush3.msra.mxu1 %v116_v51  ;;  %563 = vmatprep.subr.mxu0 %v99_v52  ;;  %v302_v19 = vld [vmem:[#allocation7 + $0x80] sm:$0xff]  ;;  %v301_v20 = vld [vmem:[#allocation7 + $0x78] sm:$0xff]  ;;  %v300_v21 = vld [vmem:[#allocation7 + $0x70] sm:$0xff] }
  0x51   :  { %598 = vmatprep.subr.mxu1 %v131_v53  ;;  %564 = vmatpush3.msra.mxu0 %v83_v54  ;;  %v299_v22 = vld [vmem:[#allocation7 + $0x68] sm:$0xff]  ;;  %v298_v23 = vld [vmem:[#allocation7 + $0x60] sm:$0xff]  ;;  %v297_v24 = vld [vmem:[#allocation7 + $0x58] sm:$0xff] }
  0x52   :  { %599 = vmatpush3.msra.mxu1 %v115_v55  ;;  %565 = vmatprep.subr.mxu0 %v98_v56  ;;  %v296_v25 = vld [vmem:[#allocation7 + $0x50] sm:$0xff]  ;;  %v295_v26 = vld [vmem:[#allocation7 + $0x48] sm:$0xff]  ;;  %v294_v27 = vld [vmem:[#allocation7 + $0x40] sm:$0xff] }
  0x53   :  { %600 = vmatprep.subr.mxu1 %v130_v57  ;;  %566 = vmatpush3.msra.mxu0 %v82_v58  ;;  %v293_v28 = vld [vmem:[#allocation7 + $0x38] sm:$0xff]  ;;  %v292_v29 = vld [vmem:[#allocation7 + $0x30] sm:$0xff]  ;;  %v291_v30 = vld [vmem:[#allocation7 + $0x28] sm:$0xff] }
  0x54   :  { %601 = vmatpush3.msra.mxu1 %v114_v59  ;;  %567 = vmatprep.subr.mxu0 %v97_v60  ;;  %v290_v31 = vld [vmem:[#allocation7 + $0x20] sm:$0xff]  ;;  %v289_v32 = vld [vmem:[#allocation7 + $0x18] sm:$0xff]  ;;  %v288_v33 = vld [vmem:[#allocation7 + $0x10] sm:$0xff] }
  0x55   :  { %602 = vmatprep.subr.mxu1 %v129_v61  ;;  %568 = vmatpush3.msra.mxu0 %v81_v62  ;;  %v287_v34 = vld [vmem:[#allocation7 + $0x8] sm:$0xff]  ;;  %v286_v35 = vld [vmem:[#allocation7] sm:$0xff]  ;;  %v434_v37 = vld [vmem:[#allocation8 + $0xf8] sm:$0xff] }
  0x56   :  { %209 = vmatprep.mubr.f32.mxu0 %v78_v63  ;;  %603 = vmatpush3.msra.mxu1 %v113_v0  ;;  %v418_v38 = vld [vmem:[#allocation8 + $0x78] sm:$0xff]  ;;  %v433_v39 = vld [vmem:[#allocation8 + $0xf0] sm:$0xff]  ;;  %v432_v41 = vld [vmem:[#allocation8 + $0xe8] sm:$0xff] }
  0x57   :  { %279 = vmatprep.mubr.f32.mxu1 %v80_v1  ;;  %210 = vmatmul.mubr.f32.vlgmr.msra.gmra.mxu0 %v77_v2  ;;  %v417_v40 = vld [vmem:[#allocation8 + $0x70] sm:$0xff]  ;;  %v416_v42 = vld [vmem:[#allocation8 + $0x68] sm:$0xff]  ;;  %v431_v43 = vld [vmem:[#allocation8 + $0xe0] sm:$0xff] }
  0x58   :  { %280 = vmatmul.mubr.f32.vlgmr.msra.gmra.mxu1 %v79_v3  ;;  %330 = vmatprep.subr.mxu0 %v317_v4  ;;  %v415_v44 = vld [vmem:[#allocation8 + $0x60] sm:$0xff]  ;;  %v430_v45 = vld [vmem:[#allocation8 + $0xd8] sm:$0xff]  ;;  %v429_v47 = vld [vmem:[#allocation8 + $0xd0] sm:$0xff] }
  0x59   :  { %331 = vmatpush1.msra.mxu0 %v316_v5  ;;  %394 = vmatprep.mubr.f32.mxu0 %v772_v36  ;;  %v414_v46 = vld [vmem:[#allocation8 + $0x58] sm:$0xff]  ;;  %v413_v48 = vld [vmem:[#allocation8 + $0x50] sm:$0xff]  ;;  %v428_v49 = vld [vmem:[#allocation8 + $0xc8] sm:$0xff] }
  0x5a   :  { %332 = vmatprep.subr.mxu0 %v315_v6  ;;  %607 = vmatprep.subr.mxu1 %v434_v37  ;;  %v412_v50 = vld [vmem:[#allocation8 + $0x48] sm:$0xff]  ;;  %v427_v51 = vld [vmem:[#allocation8 + $0xc0] sm:$0xff]  ;;  %v426_v53 = vld [vmem:[#allocation8 + $0xb8] sm:$0xff] }
  0x5b   :  { %333 = vmatpush1.msra.mxu0 %v314_v7  ;;  %608 = vmatpush3.msra.mxu1 %v418_v38  ;;  %v411_v52 = vld [vmem:[#allocation8 + $0x40] sm:$0xff]  ;;  %v410_v54 = vld [vmem:[#allocation8 + $0x38] sm:$0xff]  ;;  %v425_v55 = vld [vmem:[#allocation8 + $0xb0] sm:$0xff] }
  0x5c   :  { %334 = vmatprep.subr.mxu0 %v313_v8  ;;  %609 = vmatprep.subr.mxu1 %v433_v39  ;;  %v409_v56 = vld [vmem:[#allocation8 + $0x30] sm:$0xff]  ;;  %v424_v57 = vld [vmem:[#allocation8 + $0xa8] sm:$0xff]  ;;  %v423_v59 = vld [vmem:[#allocation8 + $0xa0] sm:$0xff] }
  0x5d   :  { %335 = vmatpush1.msra.mxu0 %v312_v9  ;;  %610 = vmatpush3.msra.mxu1 %v417_v40  ;;  %v408_v58 = vld [vmem:[#allocation8 + $0x28] sm:$0xff]  ;;  %v407_v60 = vld [vmem:[#allocation8 + $0x20] sm:$0xff]  ;;  %v422_v5 = vld [vmem:[#allocation8 + $0x98] sm:$0xff] }
  0x5e   :  { %336 = vmatprep.subr.mxu0 %v311_v10  ;;  %611 = vmatprep.subr.mxu1 %v432_v41  ;;  %v406_v6 = vld [vmem:[#allocation8 + $0x18] sm:$0xff]  ;;  %v421_v7 = vld [vmem:[#allocation8 + $0x90] sm:$0xff]  ;;  %v420_v9 = vld [vmem:[#allocation8 + $0x88] sm:$0xff] }
  0x5f   :  { %337 = vmatpush1.msra.mxu0 %v310_v11  ;;  %612 = vmatpush3.msra.mxu1 %v416_v42  ;;  %v405_v8 = vld [vmem:[#allocation8 + $0x10] sm:$0xff]  ;;  %v404_v10 = vld [vmem:[#allocation8 + $0x8] sm:$0xff]  ;;  %v419_v11 = vld [vmem:[#allocation8 + $0x80] sm:$0xff] }
  0x60   :  { %338 = vmatprep.subr.mxu0 %v309_v12  ;;  %613 = vmatprep.subr.mxu1 %v431_v43  ;;  %v403_v12 = vld [vmem:[#allocation8] sm:$0xff] }
  0x61   :  { %339 = vmatpush1.msra.mxu0 %v308_v13  ;;  %614 = vmatpush3.msra.mxu1 %v415_v44  ;;  %v320_v13 = vlaneseq }
  0x62   :  { %340 = vmatprep.subr.mxu0 %v307_v14  ;;  %615 = vmatprep.subr.mxu1 %v430_v45 }
  0x63   :  { %341 = vmatpush1.msra.mxu0 %v306_v15  ;;  %616 = vmatpush3.msra.mxu1 %v414_v46  ;;  %v321_v14 = vshrl.u32 %v320_v13, 7 }
  0x64   :  { %342 = vmatprep.subr.mxu0 %v305_v16  ;;  %617 = vmatprep.subr.mxu1 %v429_v47  ;;  %v318_v16 = vld [vmem:[%s839_s3] sm:$0x3]  ;;  %s773_s3 = smov [#allocation10]  }
  0x65   :  { %343 = vmatpush1.msra.mxu0 %v304_v17  ;;  %618 = vmatpush3.msra.mxu1 %v413_v48  ;;  %v322_v15 = vsub.s32 0, %v321_v14  ;;  %v326_v17 = vsub.s32 1, %v321_v14  ;;  %s525_s21 = sshll.u32 %s773_s3, 4  ;;  %s526_s21 = int_to_ptr.vmem [resolvable:$true] %s525_s21 }
  0x66   :  { %344 = vmatprep.subr.mxu0 %v303_v18  ;;  %619 = vmatprep.subr.mxu1 %v428_v49  ;;  %s736_s22 = scalar_lea.vmem %s526_s21, 128  ;;  %p741_p7 = scmp.lt.s32.totalorder %s526_s21, %s526_s21 }
  0x67   :  { %345 = vmatpush1.msra.mxu0 %v302_v19  ;;  %620 = vmatpush3.msra.mxu1 %v412_v50  ;;  %v323_v18 = vrot.slane %v318_v16, %v322_v15  ;;  %v327_v19 = vrot.slane %v318_v16, %v326_v17  ;;  %p737_p6 = scmp.ne.s32.totalorder %s526_s21, %s736_s22  ;;  %p742_p8 = scmp.lt.s32.totalorder %s736_s22, %s736_s22 }
  0x68   :  { %346 = vmatprep.subr.mxu0 %v301_v20  ;;  %621 = vmatprep.subr.mxu1 %v427_v51 }
  0x69   :  { %347 = vmatpush1.msra.mxu0 %v300_v21  ;;  %622 = vmatpush3.msra.mxu1 %v411_v52  ;;  %p743_p9 = por %p742_p8, %p741_p7 }
  0x6a   :  { %348 = vmatprep.subr.mxu0 %v299_v22  ;;  %623 = vmatprep.subr.mxu1 %v426_v53 }
  0x6b   :  { %349 = vmatpush1.msra.mxu0 %v298_v23  ;;  %624 = vmatpush3.msra.mxu1 %v410_v54  ;;  %p744_p10 = pnand %p743_p9, %p737_p6 }
  0x6c   :  { %350 = vmatprep.subr.mxu0 %v297_v24  ;;  %625 = vmatprep.subr.mxu1 %v425_v55 }
  0x6d   :  { %351 = vmatpush1.msra.mxu0 %v296_v25  ;;  %626 = vmatpush3.msra.mxu1 %v409_v56 }
  0x6e   :  { %352 = vmatprep.subr.mxu0 %v295_v26  ;;  %627 = vmatprep.subr.mxu1 %v424_v57 }
  0x6f   :  { %353 = vmatpush1.msra.mxu0 %v294_v27  ;;  %628 = vmatpush3.msra.mxu1 %v408_v58  ;;  %v536_v27 = vld [vmem:[%s841_s5] ss:$0 sm:$0xff] }
  0x70   :  { %354 = vmatprep.subr.mxu0 %v293_v28  ;;  %629 = vmatprep.subr.mxu1 %v423_v59 }
  0x71   :  { %355 = vmatpush1.msra.mxu0 %v292_v29  ;;  %630 = vmatpush3.msra.mxu1 %v407_v60 }
  0x72   :  { %356 = vmatprep.subr.mxu0 %v291_v30  ;;  %631 = vmatprep.subr.mxu1 %v422_v5 }
  0x73   :  { %357 = vmatpush1.msra.mxu0 %v290_v31  ;;  %632 = vmatpush3.msra.mxu1 %v406_v6 }
  0x74   :  { %358 = vmatprep.subr.mxu0 %v289_v32  ;;  %633 = vmatprep.subr.mxu1 %v421_v7 }
  0x75   :  { %359 = vmatpush1.msra.mxu0 %v288_v33  ;;  %634 = vmatpush3.msra.mxu1 %v405_v8 }
  0x76   :  { %360 = vmatprep.subr.mxu0 %v287_v34  ;;  %635 = vmatprep.subr.mxu1 %v420_v9 }
  0x77   :  { %361 = vmatpush1.msra.mxu0 %v286_v35  ;;  %636 = vmatpush3.msra.mxu1 %v404_v10 }
  0x78   :  { %637 = vmatprep.subr.mxu1 %v419_v11 }
  0x79   :  { %638 = vmatpush3.msra.mxu1 %v403_v12 }
 0x117   :  { %v569_v61 = vpop.f32.mrf.mxu0 }
 0x118   :  { %v604_v62 = vpop.f32.mrf.mxu1 }
 0x119   :  { %v570_v63 = vpop.f32.mrf.mxu0 }
 0x11a   :  { %v605_v0 = vpop.f32.mrf.mxu1  ;;  %v571_v1 = vadd.f32 %v570_v63, %v569_v61 }
 0x11b   :  { %v606_v2 = vadd.f32 %v605_v0, %v604_v62 }
 0x11d   :  { %v282_v3 = vadd.f32 %v606_v2, %v571_v1 }
 0x11f   :  { %v285_v4 = vmax.f32 %v282_v3, 0.0 }
 0x121   :  { %395 = vmatmul.mubr.f32.vlgmr.msra.gmra.mxu0 %v285_v4 }
 0x1e1   :  { %v396_v20 = vpop.f32.mrf.mxu0 }
 0x1e2   :  { %v397_v21 = vadd.f32 %v396_v20, %v323_v18 }
 0x1e3   :  { %v398_v22 = vpop.f32.mrf.mxu0 }
 0x1e4   :  { %v399_v23 = vadd.f32 %v398_v22, %v327_v19  ;;  %v401_v25 = vmax.f32 %v397_v21, 0.0 }
 0x1e6   :  { %v402_v24 = vmax.f32 %v399_v23, 0.0 }
 0x1e8   :  { %506 = vmatprep.mubr.f32.mxu1 %v402_v24 }
 0x1e9   :  { %507 = vmatmul.mubr.f32.vlgmr.msra.gmra.mxu1 %v401_v25 }
 0x2a9   :  { %v639_v26 = vpop.f32.mrf.mxu1 }
 0x2ab   :  { %v640_v28 = vpop.f32.mrf.mxu1 }
 0x2ac   :  { %v641_v29 = vadd.f32 %v640_v28, %v639_v26 }
 0x2ae   :  { %v509_v30 = vadd.f32 %v641_v29, %v536_v27 }
 0x2b0   :  { %v512_v31 = vsub.f32 0.0, %v509_v30 }
 0x2b2   :  { %v513_v32 = vmul.f32 1.442695, %v512_v31 }
 0x2b4   :  { %652 = vpow2.f32 %v513_v32 }
 0x2c1   :  { %v653_v33 = vpop.eup %652 }
 0x2c2   :  { %v515_v34 = vadd.f32 1.0, %v653_v33 }
 0x2c4   :  { %654 = vrcp.f32 %v515_v34 }
 0x2d1   :  { %v655_v35 = vpop.eup %654 }
 0x2d2   :  { %518 = vst [vmem:[#allocation10] sm:$0xff] %v655_v35 }
 0x2d3   :  { %747 = shalt.err (!%p744_p10)
}
 0x2d4   :  { %528 = dma.vmem_to_hbm [thread:$0]  %s526_s21, 128, %s842_s6, [#allocation4]  }
 0x2d5   :  { %762 = dma.done.wait [#allocation4], 128  }
 0x2d6   :  { %763 = vsyncadd [#allocation4], 4294967168 }
 0x2d7   :  { %532 = vsyncpa [#allocation3], 1 }
 0x2d8   :  { %533 = vsyncpa [#allocation6], 1 }
 0x2d9   :  { %534 = vsyncpa [#allocation9], 1 }
 0x2da   :  { %535 = vsyncpa [#allocation4], 1 }

</bundles_post_ra>
